<compile_context>
chip_gen: v5e
topology: v5e:2x2
jax: 0.10.0
libtpu: 0.0.40
codegen_flags: <defaults>
</compile_context>

<pallas_src>
import math
from functools import partial

import jax
import jax.numpy as jnp
from jax.experimental import pallas as pl
from jax.experimental.pallas import tpu as pltpu


def _round_up(x, m):
    return ((x + m - 1) // m) * m


# --------------------------------------------------------------------------- #
# Kernel: fused critic+actor MLP, 3 MXU matmuls, narrow packed output
# --------------------------------------------------------------------------- #
def ppo_fused_kernel(x_ref, w1_ref, w2_ref, w3_ref, bias_ref, out_ref):
    # x_ref   : (TB, S)       f32
    # w1_ref  : (S,  H1)      bf16   [cw1 | aw1 | 0-pad]          H1 % 128 == 0
    # w2_ref  : (H1, H2)      bf16   blockdiag(cw2, aw2), 0-pad   H2 % 128 == 0
    # w3_ref  : (H2, OUT_W)   bf16   col 0 <- cw3, cols 1..1+A <- hw, rest 0
    # bias_ref: (3, BW)       f32    row0=[cb1|ab1], row1=[cb2|ab2], row2=[cb3,hb]
    # out_ref : (TB, OUT_W)   f32    col 0 = value, cols 1..1+A = logits
    h1_w = w1_ref.shape[1]
    h2_w = w2_ref.shape[1]
    out_w = out_ref.shape[1]

    x = x_ref[...]

    b1 = bias_ref[0:1, :h1_w]
    b2 = bias_ref[1:2, :h2_w]
    b3 = bias_ref[2:3, :out_w]

    # Layer 1 (shared): x @ [cw1 | aw1]  -> (TB, H1), ReLU (valid for both halves).
    h1 = jnp.dot(x.astype(jnp.bfloat16), w1_ref[...],
                 preferred_element_type=jnp.float32) + b1
    h1 = jnp.maximum(h1, 0.0)

    # Layer 2 (block-diagonal): critic/actor streams stay independent, one matmul.
    h2 = jnp.dot(h1.astype(jnp.bfloat16), w2_ref[...],
                 preferred_element_type=jnp.float32) + b2
    h2 = jnp.maximum(h2, 0.0)

    # Fused head: value into lane 0, actor logits into lanes 1..1+A.
    out_ref[...] = jnp.dot(h2.astype(jnp.bfloat16), w3_ref[...],
                           preferred_element_type=jnp.float32) + b3


# --------------------------------------------------------------------------- #
# Parameter packing (glue, done once — NOT inside the kernel)
# --------------------------------------------------------------------------- #
def pack_params(params):
    def _row(b):
        # Accept both (N,) (PyTorch state_dict layout) and (1, N) biases.
        return jnp.asarray(b, jnp.float32).reshape(-1)

    cw1, aw1 = params["cw1"], params["aw1"]   # (S, Ch1), (S, Ah1)
    cw2, aw2 = params["cw2"], params["aw2"]   # (Ch1, Ch2), (Ah1, Ah2)
    cw3, hw = params["cw3"], params["hw"]     # (Ch2, 1), (Ah2, A)

    state_dim = cw1.shape[0]
    ch1, ah1 = cw1.shape[1], aw1.shape[1]
    ch2, ah2 = cw2.shape[1], aw2.shape[1]
    action_dim = hw.shape[1]

    # Lane-dense packed hidden widths (multiples of 128).
    h1_w = _round_up(ch1 + ah1, 128)
    h2_w = _round_up(ch2 + ah2, 128)
    # Narrow packed output: col 0 = value, cols 1..1+A = logits.
    out_w = _round_up(1 + action_dim, 8)

    # Layer 1: concat along output dim + zero-pad to 128 lanes.
    w1 = jnp.zeros((state_dim, h1_w), jnp.float32)
    w1 = w1.at[:, :ch1].set(cw1)
    w1 = w1.at[:, ch1:ch1 + ah1].set(aw1)

    # Layer 2: block-diagonal, zero-padded (padded h1 lanes are 0 -> no effect).
    w2 = jnp.zeros((h1_w, h2_w), jnp.float32)
    w2 = w2.at[:ch1, :ch2].set(cw2)
    w2 = w2.at[ch1:ch1 + ah1, ch2:ch2 + ah2].set(aw2)

    # Head: value column + logit columns.
    w3 = jnp.zeros((h2_w, out_w), jnp.float32)
    w3 = w3.at[:ch2, 0:1].set(cw3)
    w3 = w3.at[ch2:ch2 + ah2, 1:1 + action_dim].set(hw)

    # One packed bias tensor (3 rows) instead of six tiny (1, N) inputs.
    bw = _round_up(max(h1_w, h2_w, out_w), 128)
    bias = jnp.zeros((3, bw), jnp.float32)
    bias = bias.at[0, :ch1].set(_row(params["cb1"]))
    bias = bias.at[0, ch1:ch1 + ah1].set(_row(params["ab1"]))
    bias = bias.at[1, :ch2].set(_row(params["cb2"]))
    bias = bias.at[1, ch2:ch2 + ah2].set(_row(params["ab2"]))
    bias = bias.at[2, 0:1].set(_row(params["cb3"]))
    bias = bias.at[2, 1:1 + action_dim].set(_row(params["hb"]))

    return {
        "w1": w1.astype(jnp.bfloat16),
        "w2": w2.astype(jnp.bfloat16),
        "w3": w3.astype(jnp.bfloat16),
        "bias": bias,                     # stays f32
        "action_dim": int(action_dim),
        "out_w": int(out_w),
    }


# --------------------------------------------------------------------------- #
# VMEM sizing helper (lane/sublane-padded upper bound)
# --------------------------------------------------------------------------- #
def _vmem_tile_bytes(shape, itemsize):
    if len(shape) == 1:
        return _round_up(shape[0] * itemsize, 512)
    lead = 1
    for d in shape[:-2]:
        lead *= d
    rows = _round_up(shape[-2], 8)
    lanes = _round_up(shape[-1], 128)
    return lead * rows * lanes * itemsize


# --------------------------------------------------------------------------- #
# Forward wrapper (jitted end-to-end so slice/softmax/categorical fuse)
# --------------------------------------------------------------------------- #
@partial(jax.jit, static_argnames=("action_dim", "out_w", "block_b"))
def _ppo_forward_impl(state, w1, w2, w3, bias, rng_key, *,
                      action_dim, out_w, block_b):
    B, S = state.shape

    # Only pad to a sublane-aligned batch (<= 7 dead rows); the grid handles a
    # partial last block via pl.cdiv, so no full-array pad to a multiple of tb.
    b_pad = _round_up(B, 8)
    if b_pad != B:
        state = jnp.pad(state, ((0, b_pad - B), (0, 0)))

    tb = min(block_b, b_pad)
    # v7x: ensure >= 2 grid steps so both TensorCores get work on the 'parallel'
    # batch axis (negligible per-step overhead cost).
    if b_pad >= 16 and b_pad // tb < 2:
        tb = _round_up(pl.cdiv(b_pad, 2), 8)
    grid_b = pl.cdiv(b_pad, tb)

    # VMEM limit derived from actual (lane-padded, double-buffered) tiles, with
    # headroom; floored at the 32 MiB scoped default, capped at 64 MiB (v7x-safe).
    weights_bytes = (_vmem_tile_bytes(w1.shape, 2) + _vmem_tile_bytes(w2.shape, 2)
                     + _vmem_tile_bytes(w3.shape, 2) + _vmem_tile_bytes(bias.shape, 4))
    tiles_bytes = 2 * (_vmem_tile_bytes((tb, S), 4) + _vmem_tile_bytes((tb, out_w), 4))
    need = tiles_bytes + 2 * weights_bytes + (2 << 20)
    vmem_limit = int(min(max(32 << 20, 2 * need), 64 << 20))

    out = pl.pallas_call(
        ppo_fused_kernel,
        out_shape=jax.ShapeDtypeStruct((b_pad, out_w), jnp.float32),
        grid_spec=pltpu.PrefetchScalarGridSpec(
            num_scalar_prefetch=0,
            grid=(grid_b,),
            in_specs=[
                pl.BlockSpec((tb, S), lambda i: (i, 0)),            # state blocks
                pl.BlockSpec(tuple(w1.shape), lambda i: (0, 0)),    # resident weights
                pl.BlockSpec(tuple(w2.shape), lambda i: (0, 0)),
                pl.BlockSpec(tuple(w3.shape), lambda i: (0, 0)),
                pl.BlockSpec(tuple(bias.shape), lambda i: (0, 0)),  # packed biases
            ],
            # Narrow contiguous output: full 8-wide last dim per block.
            out_specs=pl.BlockSpec((tb, out_w), lambda i: (i, 0)),
        ),
        compiler_params=pltpu.CompilerParams(
            dimension_semantics=("parallel",),   # v7x: split batch grid across 2 TCs
            vmem_limit_bytes=vmem_limit,
        ),
    )(state, w1, w2, w3, bias)

    value = out[:B, 0:1]
    logits = out[:B, 1:1 + action_dim]

    # Module API returns probs; sampling uses logits directly (no log(probs)).
    probs = jax.nn.softmax(logits, axis=-1)
    action = jax.random.categorical(rng_key, logits, axis=-1)[:, None].astype(jnp.int32)
    return value, action, probs


def ppo_simple_forward(state, packed, rng_key, *, block_b=4096):
    # block_b sweep guidance: v5e/v6e tolerate 4096-8192 (128 MiB VMEM);
    # keep <= 4096 on v7x (64 MiB VMEM); >=2 grid steps are enforced above.
    return _ppo_forward_impl(
        state, packed["w1"], packed["w2"], packed["w3"], packed["bias"], rng_key,
        action_dim=packed["action_dim"], out_w=packed["out_w"], block_b=block_b)


# --------------------------------------------------------------------------- #
# Parameter init (matches the PyTorch module's init scheme)
# --------------------------------------------------------------------------- #
def _xavier_uniform(key, fan_in, fan_out):
    limit = math.sqrt(6.0 / (fan_in + fan_out))
    return jax.random.uniform(key, (fan_in, fan_out), jnp.float32, -limit, limit)


def _kaiming_uniform_default(key, fan_in, fan_out):
    # PyTorch nn.Linear default weight init == U(-1/sqrt(fan_in), 1/sqrt(fan_in))
    bound = 1.0 / math.sqrt(fan_in)
    return jax.random.uniform(key, (fan_in, fan_out), jnp.float32, -bound, bound)


def _linear_default_bias(key, fan_in, fan_out):
    bound = 1.0 / math.sqrt(fan_in)
    return jax.random.uniform(key, (1, fan_out), jnp.float32, -bound, bound)


def init_params(key, state_dim, critic_h1, critic_h2, actor_h1, actor_h2, action_dim):
    ks = jax.random.split(key, 12)
    return {
        # critic: xavier weights (layers 0, 2), default (kaiming) for final layer
        "cw1": _xavier_uniform(ks[0], state_dim, critic_h1),
        "cb1": _linear_default_bias(ks[1], state_dim, critic_h1),
        "cw2": _xavier_uniform(ks[2], critic_h1, critic_h2),
        "cb2": _linear_default_bias(ks[3], critic_h1, critic_h2),
        "cw3": _kaiming_uniform_default(ks[4], critic_h2, 1),
        "cb3": _linear_default_bias(ks[5], critic_h2, 1),
        # actor trunk: xavier weights
        "aw1": _xavier_uniform(ks[6], state_dim, actor_h1),
        "ab1": _linear_default_bias(ks[7], state_dim, actor_h1),
        "aw2": _xavier_uniform(ks[8], actor_h1, actor_h2),
        "ab2": _linear_default_bias(ks[9], actor_h1, actor_h2),
        # DiscreteHead: xavier_uniform weight, zero bias
        "hw": _xavier_uniform(ks[10], actor_h2, action_dim),
        "hb": jnp.zeros((1, action_dim), jnp.float32),
    }


# Pure-JAX reference (f32) for correctness checking.
def ppo_reference(state, params):
    relu = lambda t: jnp.maximum(t, 0.0)
    c = relu(state @ params["cw1"] + params["cb1"])
    c = relu(c @ params["cw2"] + params["cb2"])
    value = c @ params["cw3"] + params["cb3"]
    a = relu(state @ params["aw1"] + params["ab1"])
    a = relu(a @ params["aw2"] + params["ab2"])
    logits = a @ params["hw"] + params["hb"]
    probs = jax.nn.softmax(logits, axis=-1)
    return value, logits, probs


if __name__ == "__main__":
    key = jax.random.PRNGKey(0)
    k_param, k_state, k_sample, k_state2, k_sample2 = jax.random.split(key, 5)

    # small shapes consistent with the module
    B, state_dim = 2, 16
    critic_h1 = critic_h2 = 32
    actor_h1 = actor_h2 = 32
    action_dim = 4

    params = init_params(k_param, state_dim, critic_h1, critic_h2,
                         actor_h1, actor_h2, action_dim)
    packed = pack_params(params)

    # --- test 1: tiny batch (single grid step) ---
    state = jax.random.normal(k_state, (B, state_dim), jnp.float32)
    value, action, probs = ppo_simple_forward(state, packed, k_sample)
    jax.block_until_ready((value, action, probs))

    assert value.shape == (B, 1) and value.dtype == jnp.float32
    assert action.shape == (B, 1)
    assert probs.shape == (B, action_dim)
    assert bool(jnp.all(jnp.isfinite(value)))
    assert bool(jnp.allclose(jnp.sum(probs, axis=-1), 1.0, atol=1e-5))
    assert bool(jnp.all((action >= 0) & (action < action_dim)))

    ref_value, _, ref_probs = ppo_reference(state, params)
    # bf16 MXU path -> loose tolerance vs. f32 reference
    assert bool(jnp.allclose(value, ref_value, atol=5e-2, rtol=5e-2))
    assert bool(jnp.allclose(probs, ref_probs, atol=5e-2, rtol=5e-2))

    # --- test 2: multi-block grid with a partial last block (exercises pl.cdiv
    #             path, v7x tb-split, and the narrow packed output writeback) ---
    B2 = 100
    state2 = jax.random.normal(k_state2, (B2, state_dim), jnp.float32)
    value2, action2, probs2 = ppo_simple_forward(state2, packed, k_sample2, block_b=48)
    jax.block_until_ready((value2, action2, probs2))

    ref_value2, _, ref_probs2 = ppo_reference(state2, params)
    assert value2.shape == (B2, 1) and probs2.shape == (B2, action_dim)
    assert bool(jnp.allclose(value2, ref_value2, atol=5e-2, rtol=5e-2))
    assert bool(jnp.allclose(probs2, ref_probs2, atol=5e-2, rtol=5e-2))
    assert bool(jnp.all((action2 >= 0) & (action2 < action_dim)))

    print("KERNEL_OK")
</pallas_src>

<mosaic_0001>
module attributes {stable_mosaic.version = 11 : i64} {
  func.func @ppo_fused_kernel(%arg0: i32, %arg1: memref<8x16xf32, #tpu.memory_space<vmem>>, %arg2: memref<16x128xbf16, #tpu.memory_space<vmem>>, %arg3: memref<128x128xbf16, #tpu.memory_space<vmem>>, %arg4: memref<128x8xbf16, #tpu.memory_space<vmem>>, %arg5: memref<3x128xf32, #tpu.memory_space<vmem>>, %arg6: memref<8x8xf32, #tpu.memory_space<vmem>>) attributes {dimension_semantics = [#tpu.dimension_semantics<parallel>], iteration_bounds = array<i64: 1>, scalar_prefetch = 0 : i64, scratch_operands = 0 : i64, tpu.core_type = #tpu.core_type<tc>, window_params = [{transform_indices = @transform_0, window_bounds = array<i64: 8, 16>}, {pipeline_mode = #tpu.pipeline_mode<synchronous>, transform_indices = @transform_1, window_bounds = array<i64: 16, 128>}, {pipeline_mode = #tpu.pipeline_mode<synchronous>, transform_indices = @transform_2, window_bounds = array<i64: 128, 128>}, {pipeline_mode = #tpu.pipeline_mode<synchronous>, transform_indices = @transform_3, window_bounds = array<i64: 128, 8>}, {pipeline_mode = #tpu.pipeline_mode<synchronous>, transform_indices = @transform_4, window_bounds = array<i64: 3, 128>}, {transform_indices = @transform_5, window_bounds = array<i64: 8, 8>}]} {
    %c0 = arith.constant 0 : index
    %c0_0 = arith.constant 0 : index
    %0 = vector.load %arg1[%c0, %c0_0] : memref<8x16xf32, #tpu.memory_space<vmem>>, vector<8x16xf32>
    %c0_1 = arith.constant 0 : index
    %c0_2 = arith.constant 0 : index
    %1 = vector.load %arg5[%c0_1, %c0_2] : memref<3x128xf32, #tpu.memory_space<vmem>>, vector<1x128xf32>
    %c1 = arith.constant 1 : index
    %c0_3 = arith.constant 0 : index
    %2 = vector.load %arg5[%c1, %c0_3] : memref<3x128xf32, #tpu.memory_space<vmem>>, vector<1x128xf32>
    %c2 = arith.constant 2 : index
    %c0_4 = arith.constant 0 : index
    %3 = vector.load %arg5[%c2, %c0_4] : memref<3x128xf32, #tpu.memory_space<vmem>>, vector<1x8xf32>
    %4 = arith.truncf %0 : vector<8x16xf32> to vector<8x16xbf16>
    %c0_5 = arith.constant 0 : index
    %c0_6 = arith.constant 0 : index
    %5 = vector.load %arg2[%c0_5, %c0_6] : memref<16x128xbf16, #tpu.memory_space<vmem>>, vector<16x128xbf16>
    %cst = arith.constant dense<0.000000e+00> : vector<8x128xf32>
    %6 = tpu.matmul %4, %5, %cst {dimension_numbers = #tpu.dot_dimension_numbers<[1], [0], [0], [1], [0, 0, 1, 1], [], []>} : vector<8x16xbf16>, vector<16x128xbf16>, vector<8x128xf32> -> vector<8x128xf32>
    %7 = vector.broadcast %1 : vector<1x128xf32> to vector<8x128xf32>
    %8 = arith.addf %6, %7 : vector<8x128xf32>
    %cst_7 = arith.constant 0.000000e+00 : f32
    %9 = vector.broadcast %cst_7 : f32 to vector<8x128xf32>
    %10 = arith.maximumf %8, %9 : vector<8x128xf32>
    %11 = arith.truncf %10 : vector<8x128xf32> to vector<8x128xbf16>
    %c0_8 = arith.constant 0 : index
    %c0_9 = arith.constant 0 : index
    %12 = vector.load %arg3[%c0_8, %c0_9] : memref<128x128xbf16, #tpu.memory_space<vmem>>, vector<128x128xbf16>
    %cst_10 = arith.constant dense<0.000000e+00> : vector<8x128xf32>
    %13 = tpu.matmul %11, %12, %cst_10 {dimension_numbers = #tpu.dot_dimension_numbers<[1], [0], [0], [1], [0, 0, 1, 1], [], []>} : vector<8x128xbf16>, vector<128x128xbf16>, vector<8x128xf32> -> vector<8x128xf32>
    %14 = vector.broadcast %2 : vector<1x128xf32> to vector<8x128xf32>
    %15 = arith.addf %13, %14 : vector<8x128xf32>
    %cst_11 = arith.constant 0.000000e+00 : f32
    %16 = vector.broadcast %cst_11 : f32 to vector<8x128xf32>
    %17 = arith.maximumf %15, %16 : vector<8x128xf32>
    %18 = arith.truncf %17 : vector<8x128xf32> to vector<8x128xbf16>
    %c0_12 = arith.constant 0 : index
    %c0_13 = arith.constant 0 : index
    %19 = vector.load %arg4[%c0_12, %c0_13] : memref<128x8xbf16, #tpu.memory_space<vmem>>, vector<128x8xbf16>
    %cst_14 = arith.constant dense<0.000000e+00> : vector<8x8xf32>
    %20 = tpu.matmul %18, %19, %cst_14 {dimension_numbers = #tpu.dot_dimension_numbers<[1], [0], [0], [1], [0, 0, 1, 1], [], []>} : vector<8x128xbf16>, vector<128x8xbf16>, vector<8x8xf32> -> vector<8x8xf32>
    %21 = vector.broadcast %3 : vector<1x8xf32> to vector<8x8xf32>
    %22 = arith.addf %20, %21 : vector<8x8xf32>
    %c0_15 = arith.constant 0 : index
    %c0_16 = arith.constant 0 : index
    %23 = vector.load %arg6[%c0_15, %c0_16] : memref<8x8xf32, #tpu.memory_space<vmem>>, vector<8x8xf32>
    tpu.vector_store %arg6[%c0_15, %c0_16], %22 {strides = array<i32>} : memref<8x8xf32, #tpu.memory_space<vmem>>, vector<8x8xf32>,
    return
  }
  func.func @transform_0(%arg0: i32) -> (i32, i32) {
    %c0_i32 = arith.constant 0 : i32
    %c0_i32_0 = arith.constant 0 : i32
    return %arg0, %c0_i32 : i32, i32
  }
  func.func @transform_1(%arg0: i32) -> (i32, i32) {
    %c0_i32 = arith.constant 0 : i32
    %c0_i32_0 = arith.constant 0 : i32
    %c0_i32_1 = arith.constant 0 : i32
    return %c0_i32, %c0_i32_0 : i32, i32
  }
  func.func @transform_2(%arg0: i32) -> (i32, i32) {
    %c0_i32 = arith.constant 0 : i32
    %c0_i32_0 = arith.constant 0 : i32
    %c0_i32_1 = arith.constant 0 : i32
    return %c0_i32, %c0_i32_0 : i32, i32
  }
  func.func @transform_3(%arg0: i32) -> (i32, i32) {
    %c0_i32 = arith.constant 0 : i32
    %c0_i32_0 = arith.constant 0 : i32
    %c0_i32_1 = arith.constant 0 : i32
    return %c0_i32, %c0_i32_0 : i32, i32
  }
  func.func @transform_4(%arg0: i32) -> (i32, i32) {
    %c0_i32 = arith.constant 0 : i32
    %c0_i32_0 = arith.constant 0 : i32
    %c0_i32_1 = arith.constant 0 : i32
    return %c0_i32, %c0_i32_0 : i32, i32
  }
  func.func @transform_5(%arg0: i32) -> (i32, i32) {
    %c0_i32 = arith.constant 0 : i32
    %c0_i32_0 = arith.constant 0 : i32
    return %arg0, %c0_i32 : i32, i32
  }
}

</mosaic_0001>

<bundles_post_ra>
// kernel: _ppo_forward_impl.1
= control target key start
LH: loop header
LB: loop body
LE: loop exit
PB: predicated region body
PF: predicated region fallthrough
CT: control target
= control target key end

     0   :  { %vm35_vm0 = vcmask 130048   ;;  %vm212_vm1 = vcmask 64512   ;;  %s403_s1 = inlined_call_operand.vmem [shape: bf16[16,128], index: 1, kind: input, shape index: {}]   ;;  %s404_s0 = inlined_call_operand.vmem [shape: f32[8,16], index: 0, kind: input, shape index: {}]   ;;  %s405_s2 = inlined_call_operand.vmem [shape: bf16[128,128], index: 2, kind: input, shape index: {}]   ;;  %s406_s4 = inlined_call_operand.vmem [shape: f32[3,128], index: 4, kind: input, shape index: {}]   ;;  %s407_s3 = inlined_call_operand.vmem [shape: bf16[128,8], index: 3, kind: input, shape index: {}]   ;;  %s408_s5 = inlined_call_operand.vmem [shape: f32[8,8], index: 5, kind: output, shape index: {}]  }
   0x1   :  { %v287_v0 = vld [vmem:[%s403_s1] sm:$0xff]  ;;  %v295_v2 = vld [vmem:[%s405_s2 + $0x38] sm:$0xff]  ;;  %v294_v4 = vld [vmem:[%s405_s2 + $0x30] sm:$0xff] }
   0x2   :  { %v21_v1 = vld [vmem:[%s404_s0] sm:$0xff]  ;;  %46 = vmatpush.bf16.msra.mxu0 %v287_v0  ;;  %119 = vmatpush.bf16.msra.mxu1 %v295_v2  ;;  %v293_v5 = vld [vmem:[%s405_s2 + $0x28] sm:$0xff]  ;;  %v291_v7 = vld [vmem:[%s405_s2 + $0x18] sm:$0xff] }
   0x3   :  { %v25_v3 = vpack.c.bf16 %v21_v1, %v21_v1  ;;  %v292_v6 = vld [vmem:[%s405_s2 + $0x20] sm:$0xff]  ;;  %v290_v8 = vld [vmem:[%s405_s2 + $0x10] sm:$0xff]  ;;  %v289_v9 = vld [vmem:[%s405_s2 + $0x8] sm:$0xff] }
   0x4   :  { %v288_v10 = vld [vmem:[%s405_s2] sm:$0xff]  ;;  %v303_v11 = vld [vmem:[%s407_s3 + $0x38] sm:$0xff]  ;;  %v302_v12 = vld [vmem:[%s407_s3 + $0x30] sm:$0xff] }
   0x5   :  { %222 = vmatmul.msk.bf16.vlgmr.msra.gmra.mxu0 %vm35_vm0, %v25_v3  ;;  %199 = vmatpush.bf16.msra.mxu2 %v303_v11  ;;  %v301_v13 = vld [vmem:[%s407_s3 + $0x28] sm:$0xff]  ;;  %v300_v14 = vld [vmem:[%s407_s3 + $0x20] sm:$0xff]  ;;  %v299_v15 = vld [vmem:[%s407_s3 + $0x18] sm:$0xff] }
   0x6   :  { %120 = vmatpush.bf16.msra.mxu1 %v294_v4  ;;  %v298_v16 = vld [vmem:[%s407_s3 + $0x10] sm:$0xff]  ;;  %v304_v17 = vld [vmem:[%s406_s4] ss:$0 sm:$0xff]  ;;  %v297_v23 = vld [vmem:[%s407_s3 + $0x8] sm:$0xff] }
   0x7   :  { %v296_v24 = vld [vmem:[%s407_s3] sm:$0xff] }
   0x8   :  { %v305_v25 = vld [vmem:[%s406_s4 + $0x1] ss:$0 sm:$0xff]  ;;  %v306_v31 = vld [vmem:[%s406_s4 + $0x2] ss:$0 sm:$0xff] }
   0x9   :  { %200 = vmatpush.bf16.msra.mxu2 %v302_v12 }
   0xa   :  { %121 = vmatpush.bf16.msra.mxu1 %v293_v5 }
   0xd   :  { %201 = vmatpush.bf16.msra.mxu2 %v301_v13 }
   0xe   :  { %122 = vmatpush.bf16.msra.mxu1 %v292_v6 }
  0x11   :  { %202 = vmatpush.bf16.msra.mxu2 %v300_v14 }
  0x12   :  { %123 = vmatpush.bf16.msra.mxu1 %v291_v7 }
  0x15   :  { %203 = vmatpush.bf16.msra.mxu2 %v299_v15 }
  0x16   :  { %124 = vmatpush.bf16.msra.mxu1 %v290_v8 }
  0x19   :  { %204 = vmatpush.bf16.msra.mxu2 %v298_v16 }
  0x1a   :  { %125 = vmatpush.bf16.msra.mxu1 %v289_v9 }
  0x1d   :  { %205 = vmatpush.bf16.msra.mxu2 %v297_v23 }
  0x1e   :  { %126 = vmatpush.bf16.msra.mxu1 %v288_v10 }
  0x21   :  { %206 = vmatpush.bf16.msra.mxu2 %v296_v24 }
  0x82   :  { %v48_v18 = vpop.f32.mrf.mxu0 }
  0x83   :  { %v49_v19 = vadd.f32 %v304_v17, %v48_v18 }
  0x85   :  { %v52_v20 = vmax.f32 %v49_v19, 0.0 }
  0x87   :  { %v53_v21 = vpack.c.bf16 %v52_v20, %v52_v20 }
  0x89   :  { %127 = vmatmul.bf16.vlgmr.msra.gmra.mxu1 %v53_v21 }
  0x8a   :  { %v50_v22 = vpop.f32.mrf.mxu0 }
 0x106   :  { %v128_v26 = vpop.f32.mrf.mxu1 }
 0x107   :  { %v129_v27 = vadd.f32 %v305_v25, %v128_v26 }
 0x109   :  { %v132_v28 = vmax.f32 %v129_v27, 0.0 }
 0x10b   :  { %v133_v29 = vpack.c.bf16 %v132_v28, %v132_v28 }
 0x10d   :  { %207 = vmatmul.bf16.vlgmr.msra.gmra.mxu2 %v133_v29 }
 0x10e   :  { %v130_v30 = vpop.f32.mrf.mxu1 }
 0x190   :  { %v208_v32 = vpop.f32.mrf.mxu2 }
 0x191   :  { %v209_v33 = vadd.f32 %v306_v31, %v208_v32 }
 0x193   :  { %213 = vst.msk [vmem:[%s408_s5] sm:$0xff] %vm212_vm1, %v209_v33 }
 0x198   :  { %v210_v34 = vpop.f32.mrf.mxu2 }

</bundles_post_ra>
